<compile_context>
chip_gen: v5e
topology: v5e:2x2
jax: 0.10.0
libtpu: 0.0.40
codegen_flags: <defaults>
</compile_context>

<pallas_src>
import functools

import jax
import jax.numpy as jnp
from jax.experimental import pallas as pl
from jax.experimental.pallas import tpu as pltpu


def _round_up(n: int, m: int) -> int:
    return ((n + m - 1) // m) * m


def pack_params(params):
    """Pack w1/b1/w2/b2/w3/b3 into one (rows, 128) f32 slab.

    Row layout (all offsets sublane-aligned, i.e. multiples of 8):
      [r_w1 : r_w1+in ]  w1   (in, 24)
      [r_w2 : r_w2+24 ]  w2   (24, 24)
      [r_w3 : r_w3+24 ]  w3   (24, out)
      [r_b1           ]  b1   (24,)
      [r_b2           ]  b2   (24,)
      [r_b3           ]  b3   (out,)
    Returns (slab, offsets_dict).
    """
    w1, b1 = params["w1"], params["b1"]
    w2, b2 = params["w2"], params["b2"]
    w3, b3 = params["w3"], params["b3"]

    in_size, hidden = w1.shape
    out_size = w3.shape[1]

    r_w1 = 0
    r_w2 = _round_up(in_size, 8)
    r_w3 = r_w2 + _round_up(hidden, 8)
    r_b1 = r_w3 + _round_up(hidden, 8)
    r_b2 = r_b1 + 8
    r_b3 = r_b2 + 8
    rows = _round_up(r_b3 + 1, 8)
    cols = _round_up(max(hidden, out_size, in_size), 128)

    slab = jnp.zeros((rows, cols), jnp.float32)
    slab = slab.at[r_w1:r_w1 + in_size, 0:hidden].set(w1.astype(jnp.float32))
    slab = slab.at[r_w2:r_w2 + hidden, 0:hidden].set(w2.astype(jnp.float32))
    slab = slab.at[r_w3:r_w3 + hidden, 0:out_size].set(w3.astype(jnp.float32))
    slab = slab.at[r_b1, 0:hidden].set(b1.astype(jnp.float32))
    slab = slab.at[r_b2, 0:hidden].set(b2.astype(jnp.float32))
    slab = slab.at[r_b3, 0:out_size].set(b3.astype(jnp.float32))

    offs = dict(r_w1=r_w1, r_w2=r_w2, r_w3=r_w3,
                r_b1=r_b1, r_b2=r_b2, r_b3=r_b3,
                in_size=in_size, hidden=hidden, out_size=out_size)
    return slab, offs


def _mlp_kernel(x_ref, p_ref, o_ref, *, offs):
    """Fused 3-layer MLP on one batch tile. Param slab is VMEM-resident."""
    in_size, hidden, out_size = offs["in_size"], offs["hidden"], offs["out_size"]

    x = x_ref[...]                                   # (TB, in)
    p = p_ref[...]                                   # (rows, 128) packed params

    w1 = p[offs["r_w1"]:offs["r_w1"] + in_size, 0:hidden]     # (in, 24)
    w2 = p[offs["r_w2"]:offs["r_w2"] + hidden, 0:hidden]      # (24, 24)
    w3 = p[offs["r_w3"]:offs["r_w3"] + hidden, 0:out_size]    # (24, out)
    b1 = p[offs["r_b1"]:offs["r_b1"] + 1, 0:hidden]           # (1, 24)
    b2 = p[offs["r_b2"]:offs["r_b2"] + 1, 0:hidden]           # (1, 24)
    b3 = p[offs["r_b3"]:offs["r_b3"] + 1, 0:out_size]         # (1, out)

    h1 = jnp.dot(x, w1, preferred_element_type=jnp.float32) + b1
    h1 = jnp.maximum(h1, 0.0)

    h2 = jnp.dot(h1, w2, preferred_element_type=jnp.float32) + b2
    h2 = jnp.maximum(h2, 0.0)

    h3 = jnp.dot(h2, w3, preferred_element_type=jnp.float32) + b3
    o_ref[...] = h3.astype(o_ref.dtype)

    # TODO(synk): for very hot large-batch paths, emit a lane-dense (out, B)
    # transposed output to avoid masked vst on the 3-wide last dim.


def network_forward(x, params, *, block_b=512):
    """Fused 3-layer MLP forward.

    x: (B, input_size) float32
    params: dict with w1 (in,24), b1 (24,), w2 (24,24), b2 (24,),
            w3 (24,out), b3 (out,)
    block_b: batch tile size (rounded to a multiple of 8, capped at the batch).
    """
    B, in_size = x.shape
    slab, offs = pack_params(params)
    out_size = offs["out_size"]
    rows, cols = slab.shape

    # Batch tile: multiple of 8, no larger than needed. Small enough that the
    # x/out double-buffers + 32-40 KiB slab fit easily in every generation's
    # VMEM (incl. v7x's 64 MiB), large enough to amortize per-step overhead.
    tb = min(_round_up(block_b, 8), _round_up(B, 8))
    grid = (pl.cdiv(B, tb),)

    kernel = functools.partial(_mlp_kernel, offs=offs)

    return pl.pallas_call(
        kernel,
        out_shape=jax.ShapeDtypeStruct((B, out_size), jnp.float32),
        grid=grid,
        in_specs=[
            # x: blocked along batch, pipelined.
            pl.BlockSpec((tb, in_size), lambda i: (i, 0)),
            # param slab: constant block index -> stays VMEM-resident.
            pl.BlockSpec((rows, cols), lambda i: (0, 0)),
        ],
        out_specs=pl.BlockSpec((tb, out_size), lambda i: (i, 0)),
        compiler_params=pltpu.CompilerParams(
            dimension_semantics=("parallel",),  # shard batch tiles across TCs (v7x)
        ),
    )(x, slab)


def init_params(key, input_size, output_size):
    """Deterministic init mimicking nn.Linear's default U(-1/sqrt(fan_in), 1/sqrt(fan_in))."""
    ks = jax.random.split(key, 6)

    def linear(kw, kb, fan_in, fan_out):
        bound = 1.0 / jnp.sqrt(jnp.float32(fan_in))
        w = jax.random.uniform(kw, (fan_in, fan_out), jnp.float32, -bound, bound)
        b = jax.random.uniform(kb, (fan_out,), jnp.float32, -bound, bound)
        return w, b

    w1, b1 = linear(ks[0], ks[1], input_size, 24)
    w2, b2 = linear(ks[2], ks[3], 24, 24)
    w3, b3 = linear(ks[4], ks[5], 24, output_size)
    return {"w1": w1, "b1": b1, "w2": w2, "b2": b2, "w3": w3, "b3": b3}


def reference_forward(x, p):
    h1 = jnp.maximum(x @ p["w1"] + p["b1"], 0.0)
    h2 = jnp.maximum(h1 @ p["w2"] + p["b2"], 0.0)
    return h2 @ p["w3"] + p["b3"]


if __name__ == "__main__":
    INPUT_SIZE = 4    # Iris features
    OUTPUT_SIZE = 3   # 3 Iris classes
    BATCH = 16        # small demo batch; block_b=8 below exercises a 2-step grid

    key = jax.random.PRNGKey(0)
    kx, kp = jax.random.split(key)
    x = jax.random.normal(kx, (BATCH, INPUT_SIZE), jnp.float32)
    params = init_params(kp, INPUT_SIZE, OUTPUT_SIZE)

    out = network_forward(x, params, block_b=8)
    out = jax.block_until_ready(out)

    ref = reference_forward(x, params)
    assert out.shape == (BATCH, OUTPUT_SIZE)
    assert jnp.allclose(out, ref, atol=1e-5, rtol=1e-5)

    print("KERNEL_OK")
</pallas_src>

<mosaic_0001>
module attributes {stable_mosaic.version = 11 : i64} {
  func.func @_mlp_kernel(%arg0: i32, %arg1: memref<8x4xf32, #tpu.memory_space<vmem>>, %arg2: memref<80x128xf32, #tpu.memory_space<vmem>>, %arg3: memref<8x3xf32, #tpu.memory_space<vmem>>) attributes {dimension_semantics = [#tpu.dimension_semantics<parallel>], iteration_bounds = array<i64: 2>, scalar_prefetch = 0 : i64, scratch_operands = 0 : i64, tpu.core_type = #tpu.core_type<tc>, window_params = [{transform_indices = @transform_0, window_bounds = array<i64: 8, 4>}, {pipeline_mode = #tpu.pipeline_mode<synchronous>, transform_indices = @transform_1, window_bounds = array<i64: 80, 128>}, {transform_indices = @transform_2, window_bounds = array<i64: 8, 3>}]} {
    %c0 = arith.constant 0 : index
    %c0_0 = arith.constant 0 : index
    %0 = vector.load %arg1[%c0, %c0_0] : memref<8x4xf32, #tpu.memory_space<vmem>>, vector<8x4xf32>
    %c0_1 = arith.constant 0 : index
    %c0_2 = arith.constant 0 : index
    %1 = vector.load %arg2[%c0_1, %c0_2] : memref<80x128xf32, #tpu.memory_space<vmem>>, vector<80x128xf32>
    %2 = vector.extract_strided_slice %1 {offsets = [0, 0], sizes = [4, 24], strides = [1, 1]} : vector<80x128xf32> to vector<4x24xf32>
    %3 = vector.extract_strided_slice %1 {offsets = [8, 0], sizes = [24, 24], strides = [1, 1]} : vector<80x128xf32> to vector<24x24xf32>
    %4 = vector.extract_strided_slice %1 {offsets = [32, 0], sizes = [24, 3], strides = [1, 1]} : vector<80x128xf32> to vector<24x3xf32>
    %5 = vector.extract_strided_slice %1 {offsets = [56, 0], sizes = [1, 24], strides = [1, 1]} : vector<80x128xf32> to vector<1x24xf32>
    %6 = vector.extract_strided_slice %1 {offsets = [64, 0], sizes = [1, 24], strides = [1, 1]} : vector<80x128xf32> to vector<1x24xf32>
    %7 = vector.extract_strided_slice %1 {offsets = [72, 0], sizes = [1, 3], strides = [1, 1]} : vector<80x128xf32> to vector<1x3xf32>
    %cst = arith.constant dense<0.000000e+00> : vector<8x24xf32>
    %8 = tpu.matmul %0, %2, %cst {dimension_numbers = #tpu.dot_dimension_numbers<[1], [0], [0], [1], [0, 0, 1, 1], [], []>} : vector<8x4xf32>, vector<4x24xf32>, vector<8x24xf32> -> vector<8x24xf32>
    %9 = vector.broadcast %5 : vector<1x24xf32> to vector<8x24xf32>
    %10 = arith.addf %8, %9 : vector<8x24xf32>
    %cst_3 = arith.constant 0.000000e+00 : f32
    %11 = vector.broadcast %cst_3 : f32 to vector<8x24xf32>
    %12 = arith.maximumf %10, %11 : vector<8x24xf32>
    %cst_4 = arith.constant dense<0.000000e+00> : vector<8x24xf32>
    %13 = tpu.matmul %12, %3, %cst_4 {dimension_numbers = #tpu.dot_dimension_numbers<[1], [0], [0], [1], [0, 0, 1, 1], [], []>} : vector<8x24xf32>, vector<24x24xf32>, vector<8x24xf32> -> vector<8x24xf32>
    %14 = vector.broadcast %6 : vector<1x24xf32> to vector<8x24xf32>
    %15 = arith.addf %13, %14 : vector<8x24xf32>
    %cst_5 = arith.constant 0.000000e+00 : f32
    %16 = vector.broadcast %cst_5 : f32 to vector<8x24xf32>
    %17 = arith.maximumf %15, %16 : vector<8x24xf32>
    %cst_6 = arith.constant dense<0.000000e+00> : vector<8x3xf32>
    %18 = tpu.matmul %17, %4, %cst_6 {dimension_numbers = #tpu.dot_dimension_numbers<[1], [0], [0], [1], [0, 0, 1, 1], [], []>} : vector<8x24xf32>, vector<24x3xf32>, vector<8x3xf32> -> vector<8x3xf32>
    %19 = vector.broadcast %7 : vector<1x3xf32> to vector<8x3xf32>
    %20 = arith.addf %18, %19 : vector<8x3xf32>
    %c0_7 = arith.constant 0 : index
    %c0_8 = arith.constant 0 : index
    %21 = vector.load %arg3[%c0_7, %c0_8] : memref<8x3xf32, #tpu.memory_space<vmem>>, vector<8x3xf32>
    tpu.vector_store %arg3[%c0_7, %c0_8], %20 {strides = array<i32>} : memref<8x3xf32, #tpu.memory_space<vmem>>, vector<8x3xf32>,
    return
  }
  func.func @transform_0(%arg0: i32) -> (i32, i32) {
    %c0_i32 = arith.constant 0 : i32
    %c0_i32_0 = arith.constant 0 : i32
    return %arg0, %c0_i32 : i32, i32
  }
  func.func @transform_1(%arg0: i32) -> (i32, i32) {
    %c0_i32 = arith.constant 0 : i32
    %c0_i32_0 = arith.constant 0 : i32
    %c0_i32_1 = arith.constant 0 : i32
    return %c0_i32, %c0_i32_0 : i32, i32
  }
  func.func @transform_2(%arg0: i32) -> (i32, i32) {
    %c0_i32 = arith.constant 0 : i32
    %c0_i32_0 = arith.constant 0 : i32
    return %arg0, %c0_i32 : i32, i32
  }
}

</mosaic_0001>

<bundles_post_ra>
// kernel: tpu_custom_call.1
= control target key start
LH: loop header
LB: loop body
LE: loop exit
PB: predicated region body
PF: predicated region fallthrough
CT: control target
= control target key end

     0   :  { %7 = vsyncpa [#allocation3], 0  ;;  %s410_s9 = smov 0   ;;  %s437_s0 = inlined_call_operand.vmem [shape: f32[16,4], index: 0, kind: input, shape index: {}]   ;;  %s438_s1 = inlined_call_operand.hbm [shape: f32[80,128], index: 1, kind: input, shape index: {}]   ;;  %s439_s2 = inlined_call_operand.vmem [shape: f32[16,3], index: 2, kind: output, shape index: {}]  }
   0x1 LB: > { %s102_s12 = sshll.u32 %s438_s1, 4  ;;  %s314_s13 = sadd.s32 4294967295, %s390_s9   ;;  %s390_s9 = sphi %s410_s9, %s13_s9   ;;  %s103_s12 = int_to_ptr.hbm [resolvable:$true] %s102_s12 }
   0x2   : > { %p316_p0 = scmp.ge.s32.totalorder %s390_s9, 1  ;;  %p91_p1 = scmp.lt.s32.totalorder %s390_s9, 3 }
   0x3   : > { %p337_p2 = scmp.eq.s32.totalorder %s314_s13, 0  ;;  %s392_s14 = smov [#allocation2]  }
   0x4   : > { %p92_p3 = pnand %p316_p0, %p91_p1  ;;  %s104_s15 = sshll.u32 %s392_s14, 4  ;;  %s105_s15 = int_to_ptr.vmem [resolvable:$true] %s104_s15 }
   0x5   : > { %s393_s16 = smov 128   ;;  %s394_s17 = smov 8  }
   0x6   : > { %p333_p4 = pneg %p92_p3  ;;  %127 = sbr.rel (%p92_p3) target bundleno = 413 (0x19d), region = 28 }
   0x8   : > { %p334_p5 = pnand %p337_p2, %p333_p4 }
   0xa   : > { %336 = dma.hbm_to_vmem [thread:$0]  (!%p334_p5), %s103_s12, 1280, %s105_s15, [#allocation3], %s393_s16, %s393_s16, %s394_s17  }
   0xb   : > { %385 = dma.done.wait (%p337_p2), [#allocation3], 1280  }
   0xc   : > { %387 = vsyncadd (%p337_p2), [#allocation3], 4294966016  ;;  %p148_p6 = scmp.lt.s32.totalorder %s314_s13, 1  ;;  %vm172_vm0 = vcmask 1043456   ;;  %vm168_vm1 = vcmask 31744   ;;  %v157_v0 = vld [vmem:[#allocation2] sm:$0xff] }
   0xd   : > { %323 = vmatpush.msk.msra.mxu0 %vm172_vm0, %v157_v0  ;;  %v160_v2 = vld [vmem:[#allocation2 + $0x18] sm:$0xff]  ;;  %v159_v3 = vld [vmem:[#allocation2 + $0x10] sm:$0xff]  ;;  %v158_v4 = vld [vmem:[#allocation2 + $0x8] sm:$0xff]  ;;  %vm198_vm2 = vcmask 195584   ;;  %vm247_vm3 = vcmask 23552  }
   0xe   : > { %s441_s13 = smov (!%p148_p6, %s314_s13), 1  ;;  %215 = vmatpush.msra.mxu1 %v160_v2  ;;  %v164_v5 = vld [vmem:[#allocation2 + $0x38] sm:$0xff]  ;;  %v163_v10 = vld [vmem:[#allocation2 + $0x30] sm:$0xff]  ;;  %v162_v11 = vld [vmem:[#allocation2 + $0x28] sm:$0xff] }
   0xf   : > { %s321_s18 = sshll.u32 %s441_s13, 3  ;;  %v167_v6 = vperm.slane %v164_v5, 0  ;;  %240 = vmatpush.msra.mxu2 %v163_v10  ;;  %v161_v12 = vld [vmem:[#allocation2 + $0x20] sm:$0xff]  ;;  %v166_v18 = vld [vmem:[#allocation2 + $0x48] sm:$0xff] }
  0x10   : > { %s151_s21 = scalar_lea.vmem %s437_s0, %s321_s18  ;;  %216 = vmatpush.msra.mxu1 %v159_v3  ;;  %v165_v13 = vld [vmem:[#allocation2 + $0x40] sm:$0xff]  ;;  %v223_v19 = vperm.slane %v166_v18, 0  ;;  %s155_s24 = scalar_lea.vmem %s439_s2, %s321_s18 }
  0x11   : > { %v156_v1 = vld [vmem:[%s151_s21] sm:$0xff]  ;;  %241 = vmatpush.msra.mxu2 %v162_v11  ;;  %v197_v14 = vperm.slane %v165_v13, 0 }
  0x12   : > { %324 = vmatmul.msk.f32.vlgmr.msra.gmra.mxu0 %vm168_vm1, %v156_v1  ;;  %217 = vmatpush.msra.mxu1 %v158_v4 }
  0x13   : > { %242 = vmatpush.msra.mxu2 %v161_v12 }
  0x8f   : > { %v193_v7 = vpop.f32.mrf.mxu0 }
  0x90   : > { %v194_v8 = vadd.f32 %v193_v7, %v167_v6 }
  0x92   : > { %v196_v9 = vmax.f32 %v194_v8, 0.0 }
  0x94   : > { %325 = vmatmul.msk.f32.vlgmr.msra.gmra.mxu1 %vm198_vm2, %v196_v9 }
 0x111   : > { %v219_v15 = vpop.f32.mrf.mxu1 }
 0x112   : > { %v220_v16 = vadd.f32 %v219_v15, %v197_v14 }
 0x114   : > { %v222_v17 = vmax.f32 %v220_v16, 0.0 }
 0x116   : > { %326 = vmatmul.msk.f32.vlgmr.msra.gmra.mxu2 %vm198_vm2, %v222_v17 }
 0x199   : > { %v244_v20 = vpop.f32.mrf.mxu2 }
 0x19a   : > { %v245_v21 = vadd.f32 %v244_v20, %v223_v19 }
 0x19c   : > { %248 = vst.msk [vmem:[%s155_s24] sm:$0xff] %vm247_vm3, %v245_v21 }
 0x19d PF: > { %s13_s9 = sadd.s32 1, %s390_s9  }
 0x19e   : > { %p10_p7 = scmp.ge.s32.totalorder %s13_s9, 4  }
 0x1a0   :  { %12 = sbr.rel (!%p10_p7) target bundleno = 1 (0x1), region = 63 }
 0x1a5   :  { %268 = vsyncpa [#allocation3], 1 }
 0x1a6   :  { %270 = vsyncpa [#allocation3 + $0x1], 1 }

</bundles_post_ra>
